<compile_context>
chip_gen: v5e
topology: v5e:2x2
jax: 0.10.0
libtpu: 0.0.40
codegen_flags: <defaults>
</compile_context>

<pallas_src>
import math

import jax
import jax.numpy as jnp
from jax.experimental import pallas as pl
from jax.experimental.pallas import tpu as pltpu


# ----------------------------------------------------------------------------
# Row-tile selection: largest divisor of H whose f32 accumulator (TH*W, Cout)
# stays within `budget` bytes (~4 vregs by default; raise toward 32-64 KiB for
# wide real-size images if per-step overhead dominates).
# ----------------------------------------------------------------------------
def _pick_row_tile(H, W, Cout, pool, budget=16 * 1024):
    step = 2 if pool else 1
    for th in range(H, 0, -1):
        if H % th or th % step:
            continue
        if th * W * Cout * 4 <= budget:
            return th
    return step


# ----------------------------------------------------------------------------
# Fused 3x3 conv (stride 1, pad 1) + folded-BN affine + ReLU (+ optional fused
# 2x2 maxpool).  grid = (N, H // TH); input block is the full image (fetched
# once per n thanks to the constant block index), output block is one row tile.
# ----------------------------------------------------------------------------
def conv_block(x, w9, scale, shift, pool):
    N, H, W, Cin = x.shape
    Cout = w9.shape[-1]
    K3 = w9.shape[1]
    assert K3 == 3 * Cin

    TH = _pick_row_tile(H, W, Cout, pool)
    n_ht = H // TH
    if pool:
        Ho, Wo, THo = H // 2, W // 2, TH // 2
    else:
        Ho, Wo, THo = H, W, TH

    def kernel(x_ref, w_ref, s_ref, b_ref, o_ref):
        ht = pl.program_id(1)
        r0 = pl.multiple_of(ht * TH, TH)

        # Assemble the (TH+2, W, Cin) halo'd row tile from the resident image.
        mid = x_ref[0, pl.ds(r0, TH), :, :]                         # (TH, W, Cin)
        top = x_ref[0, pl.ds(jnp.maximum(r0 - 1, 0), 1), :, :]      # (1, W, Cin)
        bot = x_ref[0, pl.ds(jnp.minimum(r0 + TH, H - 1), 1), :, :]
        top = jnp.where(ht == 0, jnp.zeros_like(top), top)          # zero halo at image edge
        bot = jnp.where(ht == n_ht - 1, jnp.zeros_like(bot), bot)
        rows = jnp.concatenate([top, mid, bot], axis=0)             # (TH+2, W, Cin)

        acc = jnp.zeros((TH * W, Cout), jnp.float32)
        for ky in range(3):
            xk = rows[ky:ky + TH]                                   # (TH, W, Cin)
            zc = jnp.zeros((TH, 1, Cin), xk.dtype)
            xl = jnp.concatenate([zc, xk[:, :W - 1, :]], axis=1)    # x[.., w-1, ..]
            xr = jnp.concatenate([xk[:, 1:, :], zc], axis=1)        # x[.., w+1, ..]
            # im2col along kx: K = 3*Cin for one MXU matmul per ky.
            cols = jnp.concatenate([xl, xk, xr], axis=-1)           # (TH, W, 3*Cin)
            acc = acc + jnp.dot(cols.reshape(TH * W, 3 * Cin), w_ref[ky],
                                preferred_element_type=jnp.float32)

        y = acc * s_ref[...] + b_ref[...]          # folded BatchNorm (eval mode)
        y = jnp.maximum(y, 0.0)                    # ReLU
        y = y.reshape(TH, W, Cout)
        if pool:                                   # fused 2x2 maxpool
            y = jnp.max(y.reshape(TH, Wo, 2, Cout), axis=2)
            y = jnp.max(y.reshape(THo, 2, Wo, Cout), axis=1)
        o_ref[0] = y.astype(o_ref.dtype)

    return pl.pallas_call(
        kernel,
        out_shape=jax.ShapeDtypeStruct((N, Ho, Wo, Cout), jnp.bfloat16),
        grid=(N, n_ht),
        in_specs=[
            pl.BlockSpec((1, H, W, Cin), lambda n, h: (n, 0, 0, 0)),
            pl.BlockSpec((3, K3, Cout), lambda n, h: (0, 0, 0)),
            pl.BlockSpec((1, Cout), lambda n, h: (0, 0)),
            pl.BlockSpec((1, Cout), lambda n, h: (0, 0)),
        ],
        out_specs=pl.BlockSpec((1, THo, Wo, Cout), lambda n, h: (n, h, 0, 0)),
        compiler_params=pltpu.CompilerParams(
            dimension_semantics=("parallel", "parallel")),
    )(x, w9, scale, shift)


# ----------------------------------------------------------------------------
# Dense (Linear): y = x @ W + b, optional ReLU.  K-tiled with an f32 VMEM
# scratch accumulator so the weight streams through VMEM (never fully
# resident), which is what the real 176128x500 dense1 requires.
# ----------------------------------------------------------------------------
def dense(x, w, b, relu, out_dtype, tk=2048):
    M, K = x.shape
    Kw, Nf = w.shape
    assert K == Kw
    x = x.astype(jnp.bfloat16)
    w = w.astype(jnp.bfloat16)

    if K <= tk:
        TK = K
    else:
        TK = tk
        Kp = pl.cdiv(K, TK) * TK
        if Kp != K:                       # zero-pad K to a tile multiple
            x = jnp.pad(x, ((0, 0), (0, Kp - K)))
            w = jnp.pad(w, ((0, Kp - K), (0, 0)))
            K = Kp
    nk = K // TK

    def kernel(x_ref, w_ref, b_ref, o_ref, acc_ref):
        k = pl.program_id(0)

        @pl.when(k == 0)
        def _():
            acc_ref[...] = jnp.zeros_like(acc_ref)

        acc_ref[...] += jnp.dot(x_ref[...], w_ref[...],
                                preferred_element_type=jnp.float32)

        @pl.when(k == pl.num_programs(0) - 1)
        def _():
            y = acc_ref[...] + b_ref[...]
            if relu:
                y = jnp.maximum(y, 0.0)
            o_ref[...] = y.astype(o_ref.dtype)

    return pl.pallas_call(
        kernel,
        out_shape=jax.ShapeDtypeStruct((M, Nf), out_dtype),
        grid=(nk,),
        in_specs=[
            pl.BlockSpec((M, TK), lambda k: (0, k)),
            pl.BlockSpec((TK, Nf), lambda k: (k, 0)),
            pl.BlockSpec((1, Nf), lambda k: (0, 0)),
        ],
        out_specs=pl.BlockSpec((M, Nf), lambda k: (0, 0)),
        scratch_shapes=[pltpu.VMEM((M, Nf), jnp.float32)],
        compiler_params=pltpu.CompilerParams(
            dimension_semantics=("arbitrary",),
            vmem_limit_bytes=64 * 1024 * 1024),
    )(x, w, b)


# ----------------------------------------------------------------------------
# Parameter construction (deterministic, synthetic).  BatchNorm (gamma, beta,
# running stats) and the conv bias are folded into per-channel scale/shift:
#   y = conv(x)*scale + shift,
#   scale = gamma / sqrt(var + eps),  shift = (bias - mean)*scale + beta.
# Conv weights are stored as (3, 3*Cin, Cout) bf16 (kx folded into K).
# ----------------------------------------------------------------------------
def make_conv_bn_params(key, cin, cout, cin_pad=None):
    k = jax.random.split(key, 6)
    fan_in = cin * 9
    bound = 1.0 / math.sqrt(fan_in)
    w = jax.random.uniform(k[0], (3, 3, cin, cout), jnp.float32, -bound, bound)
    bias = jax.random.uniform(k[1], (cout,), jnp.float32, -bound, bound)
    gamma = jax.random.uniform(k[2], (cout,), jnp.float32, 0.9, 1.1)
    beta = jax.random.uniform(k[3], (cout,), jnp.float32, -0.1, 0.1)
    mean = 0.1 * jax.random.normal(k[4], (cout,), jnp.float32)
    var = jax.random.uniform(k[5], (cout,), jnp.float32, 0.5, 1.5)
    eps = 1e-5
    scale = gamma / jnp.sqrt(var + eps)
    shift = (bias - mean) * scale + beta
    if cin_pad is not None and cin_pad > cin:
        w = jnp.pad(w, ((0, 0), (0, 0), (0, cin_pad - cin), (0, 0)))
        cin = cin_pad
    w9 = w.reshape(3, 3 * cin, cout).astype(jnp.bfloat16)   # (ky, kx*Cin+c, cout)
    return (w9,
            scale.reshape(1, cout).astype(jnp.float32),
            shift.reshape(1, cout).astype(jnp.float32))


def make_dense_params(key, fin, fout):
    k1, k2 = jax.random.split(key)
    bound = 1.0 / math.sqrt(fin)
    w = jax.random.uniform(k1, (fin, fout), jnp.float32, -bound, bound)
    b = jax.random.uniform(k2, (fout,), jnp.float32, -bound, bound)
    return w, b


def init_params(key, h, w):
    chans = [(1, 32), (32, 32), (32, 64), (64, 64),
             (64, 128), (128, 128), (128, 256), (256, 256)]
    keys = jax.random.split(key, 10)
    params = {}
    for i, (cin, cout) in enumerate(chans, start=1):
        cpad = 8 if cin == 1 else cin     # conv1 input channels padded 1 -> 8 (zeros)
        w9, sc, sh = make_conv_bn_params(keys[i - 1], cin, cout, cpad)
        params[f"w{i}"], params[f"s{i}"], params[f"sh{i}"] = w9, sc, sh

    hf, wf, C = h // 8, w // 8, 256
    flat = C * hf * wf                    # 176128 at the original input size
    d1w, d1b = make_dense_params(keys[8], flat, 500)   # rows in torch NCHW flatten order

    # One-time row permutation so dense1 consumes the NHWC flatten order
    # directly (no runtime NHWC->NCHW transpose of the feature map).
    i_ = jnp.arange(flat)
    c = i_ % C
    hw = i_ // C
    w_ = hw % wf
    h_ = hw // wf
    nchw_idx = c * (hf * wf) + h_ * wf + w_
    d1w = d1w[nchw_idx]

    # Pad output dim 500 -> 512 for lane-dense stores (padded cols/bias zero).
    d1w = jnp.pad(d1w, ((0, 0), (0, 12)))
    d1b = jnp.pad(d1b, (0, 12))
    params["d1_w"] = d1w.astype(jnp.bfloat16)
    params["d1_b"] = d1b.reshape(1, 512).astype(jnp.float32)

    d2w, d2b = make_dense_params(keys[9], 500, 2)
    d2w = jnp.pad(d2w, ((0, 12), (0, 0)))               # rows 500 -> 512 (zeros)
    params["d2_w"] = d2w.astype(jnp.bfloat16)
    params["d2_b"] = d2b.reshape(1, 2).astype(jnp.float32)
    return params


# ----------------------------------------------------------------------------
# Full forward pass (mirrors CNN.forward, eval mode).
# ----------------------------------------------------------------------------
def cnn_forward(x_nchw, params):
    n = x_nchw.shape[0]
    x = jnp.transpose(x_nchw, (0, 2, 3, 1)).astype(jnp.bfloat16)   # NCHW -> NHWC
    x = jnp.pad(x, ((0, 0), (0, 0), (0, 0), (0, 7)))               # C: 1 -> 8 (zeros)

    x = conv_block(x, params["w1"], params["s1"], params["sh1"], pool=False)
    x = conv_block(x, params["w2"], params["s2"], params["sh2"], pool=True)   # + maxpool
    x = conv_block(x, params["w3"], params["s3"], params["sh3"], pool=False)
    x = conv_block(x, params["w4"], params["s4"], params["sh4"], pool=True)   # + maxpool
    x = conv_block(x, params["w5"], params["s5"], params["sh5"], pool=False)
    x = conv_block(x, params["w6"], params["s6"], params["sh6"], pool=True)   # + maxpool
    x = conv_block(x, params["w7"], params["s7"], params["sh7"], pool=False)
    x = conv_block(x, params["w8"], params["s8"], params["sh8"], pool=False)

    # NHWC flatten; dense1 weight rows were permuted at init so this matches
    # torch's x.view(N, -1) on NCHW exactly.
    x = x.reshape(n, -1)

    x = dense(x, params["d1_w"], params["d1_b"], relu=True, out_dtype=jnp.bfloat16)
    # Dropout(0.5): identity in eval mode.
    x = dense(x, params["d2_w"], params["d2_b"], relu=False, out_dtype=jnp.float32)
    return x


if __name__ == "__main__":
    key = jax.random.PRNGKey(0)
    k_x, k_p = jax.random.split(key)

    # Small input consistent with the module: NCHW, 1 input channel.
    # (At this size the flatten width is 256*2*2 = 1024 instead of 176128; the
    # dense1 weight is sized accordingly, forward semantics are unchanged.)
    N, C, H, W = 2, 1, 16, 16
    x = jax.random.normal(k_x, (N, C, H, W), jnp.float32)

    params = init_params(k_p, H, W)

    out = cnn_forward(x, params)
    out = jax.block_until_ready(out)
    assert out.shape == (N, 2), out.shape
    print("KERNEL_OK")
</pallas_src>

<mosaic_0001>
module attributes {stable_mosaic.version = 11 : i64} {
  func.func @kernel(%arg0: i32, %arg1: i32, %arg2: memref<1x16x16x8xbf16, #tpu.memory_space<vmem>>, %arg3: memref<3x24x32xbf16, #tpu.memory_space<vmem>>, %arg4: memref<1x32xf32, #tpu.memory_space<vmem>>, %arg5: memref<1x32xf32, #tpu.memory_space<vmem>>, %arg6: memref<1x8x16x32xbf16, #tpu.memory_space<vmem>>) attributes {dimension_semantics = [#tpu.dimension_semantics<parallel>, #tpu.dimension_semantics<parallel>], iteration_bounds = array<i64: 2, 2>, scalar_prefetch = 0 : i64, scratch_operands = 0 : i64, tpu.core_type = #tpu.core_type<tc>, window_params = [{transform_indices = @transform_0, window_bounds = array<i64: 1, 16, 16, 8>}, {pipeline_mode = #tpu.pipeline_mode<synchronous>, transform_indices = @transform_1, window_bounds = array<i64: 3, 24, 32>}, {pipeline_mode = #tpu.pipeline_mode<synchronous>, transform_indices = @transform_2, window_bounds = array<i64: 1, 32>}, {pipeline_mode = #tpu.pipeline_mode<synchronous>, transform_indices = @transform_3, window_bounds = array<i64: 1, 32>}, {transform_indices = @transform_4, window_bounds = array<i64: 1, 8, 16, 32>}]} {
    %c8_i32 = arith.constant 8 : i32
    %0 = arith.muli %arg1, %c8_i32 : i32
    %1 = tpu.assume_multiple %0, 8 : i32
    %c0 = arith.constant 0 : index
    %2 = arith.index_cast %1 : i32 to index
    %c0_0 = arith.constant 0 : index
    %c0_1 = arith.constant 0 : index
    %3 = vector.load %arg2[%c0, %2, %c0_0, %c0_1] : memref<1x16x16x8xbf16, #tpu.memory_space<vmem>>, vector<1x8x16x8xbf16>
    %4 = vector.shape_cast %3 : vector<1x8x16x8xbf16> to vector<8x16x8xbf16>
    %c1_i32 = arith.constant 1 : i32
    %5 = arith.subi %1, %c1_i32 : i32
    %c0_i32 = arith.constant 0 : i32
    %6 = arith.maxsi %5, %c0_i32 : i32
    %c0_2 = arith.constant 0 : index
    %7 = arith.index_cast %6 : i32 to index
    %c0_3 = arith.constant 0 : index
    %c0_4 = arith.constant 0 : index
    %8 = vector.load %arg2[%c0_2, %7, %c0_3, %c0_4] : memref<1x16x16x8xbf16, #tpu.memory_space<vmem>>, vector<1x1x16x8xbf16>
    %9 = vector.shape_cast %8 : vector<1x1x16x8xbf16> to vector<1x16x8xbf16>
    %c8_i32_5 = arith.constant 8 : i32
    %10 = arith.addi %1, %c8_i32_5 : i32
    %c15_i32 = arith.constant 15 : i32
    %11 = arith.minsi %10, %c15_i32 : i32
    %c0_6 = arith.constant 0 : index
    %12 = arith.index_cast %11 : i32 to index
    %c0_7 = arith.constant 0 : index
    %c0_8 = arith.constant 0 : index
    %13 = vector.load %arg2[%c0_6, %12, %c0_7, %c0_8] : memref<1x16x16x8xbf16, #tpu.memory_space<vmem>>, vector<1x1x16x8xbf16>
    %14 = vector.shape_cast %13 : vector<1x1x16x8xbf16> to vector<1x16x8xbf16>
    %c0_i32_9 = arith.constant 0 : i32
    %15 = arith.cmpi eq, %arg1, %c0_i32_9 : i32
    %cst = arith.constant 0.000000e+00 : bf16
    %16 = vector.broadcast %cst : bf16 to vector<1x16x8xbf16>
    %17 = arith.select %15, %16, %9 : vector<1x16x8xbf16>
    %c1_i32_10 = arith.constant 1 : i32
    %18 = arith.cmpi eq, %arg1, %c1_i32_10 : i32
    %cst_11 = arith.constant 0.000000e+00 : bf16
    %19 = vector.broadcast %cst_11 : bf16 to vector<1x16x8xbf16>
    %20 = arith.select %18, %19, %14 : vector<1x16x8xbf16>
    %21 = tpu.concatenate %17, %4, %20 in 0 : vector<1x16x8xbf16>, vector<8x16x8xbf16>, vector<1x16x8xbf16> -> vector<10x16x8xbf16>
    %cst_12 = arith.constant 0.000000e+00 : f32
    %22 = vector.broadcast %cst_12 : f32 to vector<128x32xf32>
    %23 = vector.extract_strided_slice %21 {offsets = [0, 0, 0], sizes = [8, 16, 8], strides = [1, 1, 1]} : vector<10x16x8xbf16> to vector<8x16x8xbf16>
    %cst_13 = arith.constant 0.000000e+00 : bf16
    %24 = vector.broadcast %cst_13 : bf16 to vector<8x1x8xbf16>
    %25 = vector.extract_strided_slice %23 {offsets = [0, 0, 0], sizes = [8, 15, 8], strides = [1, 1, 1]} : vector<8x16x8xbf16> to vector<8x15x8xbf16>
    %26 = tpu.concatenate %24, %25 in 1 : vector<8x1x8xbf16>, vector<8x15x8xbf16> -> vector<8x16x8xbf16>
    %27 = vector.extract_strided_slice %23 {offsets = [0, 1, 0], sizes = [8, 15, 8], strides = [1, 1, 1]} : vector<8x16x8xbf16> to vector<8x15x8xbf16>
    %28 = tpu.concatenate %27, %24 in 1 : vector<8x15x8xbf16>, vector<8x1x8xbf16> -> vector<8x16x8xbf16>
    %29 = tpu.concatenate %26, %23, %28 in 2 : vector<8x16x8xbf16>, vector<8x16x8xbf16>, vector<8x16x8xbf16> -> vector<8x16x24xbf16>
    %30 = vector.shape_cast %29 : vector<8x16x24xbf16> to vector<128x24xbf16>
    %c0_14 = arith.constant 0 : index
    %c0_15 = arith.constant 0 : index
    %c0_16 = arith.constant 0 : index
    %31 = vector.load %arg3[%c0_14, %c0_15, %c0_16] : memref<3x24x32xbf16, #tpu.memory_space<vmem>>, vector<1x24x32xbf16>
    %32 = vector.shape_cast %31 : vector<1x24x32xbf16> to vector<24x32xbf16>
    %cst_17 = arith.constant dense<0.000000e+00> : vector<128x32xf32>
    %33 = tpu.matmul %30, %32, %cst_17 {dimension_numbers = #tpu.dot_dimension_numbers<[1], [0], [0], [1], [0, 0, 1, 1], [], []>} : vector<128x24xbf16>, vector<24x32xbf16>, vector<128x32xf32> -> vector<128x32xf32>
    %34 = arith.addf %22, %33 : vector<128x32xf32>
    %35 = vector.extract_strided_slice %21 {offsets = [1, 0, 0], sizes = [8, 16, 8], strides = [1, 1, 1]} : vector<10x16x8xbf16> to vector<8x16x8xbf16>
    %cst_18 = arith.constant 0.000000e+00 : bf16
    %36 = vector.broadcast %cst_18 : bf16 to vector<8x1x8xbf16>
    %37 = vector.extract_strided_slice %35 {offsets = [0, 0, 0], sizes = [8, 15, 8], strides = [1, 1, 1]} : vector<8x16x8xbf16> to vector<8x15x8xbf16>
    %38 = tpu.concatenate %36, %37 in 1 : vector<8x1x8xbf16>, vector<8x15x8xbf16> -> vector<8x16x8xbf16>
    %39 = vector.extract_strided_slice %35 {offsets = [0, 1, 0], sizes = [8, 15, 8], strides = [1, 1, 1]} : vector<8x16x8xbf16> to vector<8x15x8xbf16>
    %40 = tpu.concatenate %39, %36 in 1 : vector<8x15x8xbf16>, vector<8x1x8xbf16> -> vector<8x16x8xbf16>
    %41 = tpu.concatenate %38, %35, %40 in 2 : vector<8x16x8xbf16>, vector<8x16x8xbf16>, vector<8x16x8xbf16> -> vector<8x16x24xbf16>
    %42 = vector.shape_cast %41 : vector<8x16x24xbf16> to vector<128x24xbf16>
    %c1 = arith.constant 1 : index
    %c0_19 = arith.constant 0 : index
    %c0_20 = arith.constant 0 : index
    %43 = vector.load %arg3[%c1, %c0_19, %c0_20] : memref<3x24x32xbf16, #tpu.memory_space<vmem>>, vector<1x24x32xbf16>
    %44 = vector.shape_cast %43 : vector<1x24x32xbf16> to vector<24x32xbf16>
    %cst_21 = arith.constant dense<0.000000e+00> : vector<128x32xf32>
    %45 = tpu.matmul %42, %44, %cst_21 {dimension_numbers = #tpu.dot_dimension_numbers<[1], [0], [0], [1], [0, 0, 1, 1], [], []>} : vector<128x24xbf16>, vector<24x32xbf16>, vector<128x32xf32> -> vector<128x32xf32>
    %46 = arith.addf %34, %45 : vector<128x32xf32>
    %47 = vector.extract_strided_slice %21 {offsets = [2, 0, 0], sizes = [8, 16, 8], strides = [1, 1, 1]} : vector<10x16x8xbf16> to vector<8x16x8xbf16>
    %cst_22 = arith.constant 0.000000e+00 : bf16
    %48 = vector.broadcast %cst_22 : bf16 to vector<8x1x8xbf16>
    %49 = vector.extract_strided_slice %47 {offsets = [0, 0, 0], sizes = [8, 15, 8], strides = [1, 1, 1]} : vector<8x16x8xbf16> to vector<8x15x8xbf16>
    %50 = tpu.concatenate %48, %49 in 1 : vector<8x1x8xbf16>, vector<8x15x8xbf16> -> vector<8x16x8xbf16>
    %51 = vector.extract_strided_slice %47 {offsets = [0, 1, 0], sizes = [8, 15, 8], strides = [1, 1, 1]} : vector<8x16x8xbf16> to vector<8x15x8xbf16>
    %52 = tpu.concatenate %51, %48 in 1 : vector<8x15x8xbf16>, vector<8x1x8xbf16> -> vector<8x16x8xbf16>
    %53 = tpu.concatenate %50, %47, %52 in 2 : vector<8x16x8xbf16>, vector<8x16x8xbf16>, vector<8x16x8xbf16> -> vector<8x16x24xbf16>
    %54 = vector.shape_cast %53 : vector<8x16x24xbf16> to vector<128x24xbf16>
    %c2 = arith.constant 2 : index
    %c0_23 = arith.constant 0 : index
    %c0_24 = arith.constant 0 : index
    %55 = vector.load %arg3[%c2, %c0_23, %c0_24] : memref<3x24x32xbf16, #tpu.memory_space<vmem>>, vector<1x24x32xbf16>
    %56 = vector.shape_cast %55 : vector<1x24x32xbf16> to vector<24x32xbf16>
    %cst_25 = arith.constant dense<0.000000e+00> : vector<128x32xf32>
    %57 = tpu.matmul %54, %56, %cst_25 {dimension_numbers = #tpu.dot_dimension_numbers<[1], [0], [0], [1], [0, 0, 1, 1], [], []>} : vector<128x24xbf16>, vector<24x32xbf16>, vector<128x32xf32> -> vector<128x32xf32>
    %58 = arith.addf %46, %57 : vector<128x32xf32>
    %c0_26 = arith.constant 0 : index
    %c0_27 = arith.constant 0 : index
    %59 = vector.load %arg4[%c0_26, %c0_27] : memref<1x32xf32, #tpu.memory_space<vmem>>, vector<1x32xf32>
    %60 = vector.broadcast %59 : vector<1x32xf32> to vector<128x32xf32>
    %61 = arith.mulf %58, %60 : vector<128x32xf32>
    %c0_28 = arith.constant 0 : index
    %c0_29 = arith.constant 0 : index
    %62 = vector.load %arg5[%c0_28, %c0_29] : memref<1x32xf32, #tpu.memory_space<vmem>>, vector<1x32xf32>
    %63 = vector.broadcast %62 : vector<1x32xf32> to vector<128x32xf32>
    %64 = arith.addf %61, %63 : vector<128x32xf32>
    %cst_30 = arith.constant 0.000000e+00 : f32
    %65 = vector.broadcast %cst_30 : f32 to vector<128x32xf32>
    %66 = arith.maximumf %64, %65 : vector<128x32xf32>
    %67 = vector.shape_cast %66 : vector<128x32xf32> to vector<8x16x32xf32>
    %68 = arith.truncf %67 : vector<8x16x32xf32> to vector<8x16x32xbf16>
    %c0_31 = arith.constant 0 : index
    %c0_32 = arith.constant 0 : index
    %c0_33 = arith.constant 0 : index
    %c0_34 = arith.constant 0 : index
    %69 = vector.load %arg6[%c0_31, %c0_32, %c0_33, %c0_34] : memref<1x8x16x32xbf16, #tpu.memory_space<vmem>>, vector<1x8x16x32xbf16>
    %70 = vector.shape_cast %69 : vector<1x8x16x32xbf16> to vector<8x16x32xbf16>
    %71 = vector.shape_cast %68 : vector<8x16x32xbf16> to vector<1x8x16x32xbf16>
    tpu.vector_store %arg6[%c0_31, %c0_32, %c0_33, %c0_34], %71 {strides = array<i32>} : memref<1x8x16x32xbf16, #tpu.memory_space<vmem>>, vector<1x8x16x32xbf16>,
    return
  }
  func.func @transform_0(%arg0: i32, %arg1: i32) -> (i32, i32, i32, i32) {
    %c0_i32 = arith.constant 0 : i32
    %c0_i32_0 = arith.constant 0 : i32
    %c0_i32_1 = arith.constant 0 : i32
    %c0_i32_2 = arith.constant 0 : i32
    return %arg0, %c0_i32, %c0_i32_0, %c0_i32_1 : i32, i32, i32, i32
  }
  func.func @transform_1(%arg0: i32, %arg1: i32) -> (i32, i32, i32) {
    %c0_i32 = arith.constant 0 : i32
    %c0_i32_0 = arith.constant 0 : i32
    %c0_i32_1 = arith.constant 0 : i32
    %c0_i32_2 = arith.constant 0 : i32
    return %c0_i32, %c0_i32_0, %c0_i32_1 : i32, i32, i32
  }
  func.func @transform_2(%arg0: i32, %arg1: i32) -> (i32, i32) {
    %c0_i32 = arith.constant 0 : i32
    %c0_i32_0 = arith.constant 0 : i32
    %c0_i32_1 = arith.constant 0 : i32
    return %c0_i32, %c0_i32_0 : i32, i32
  }
  func.func @transform_3(%arg0: i32, %arg1: i32) -> (i32, i32) {
    %c0_i32 = arith.constant 0 : i32
    %c0_i32_0 = arith.constant 0 : i32
    %c0_i32_1 = arith.constant 0 : i32
    return %c0_i32, %c0_i32_0 : i32, i32
  }
  func.func @transform_4(%arg0: i32, %arg1: i32) -> (i32, i32, i32, i32) {
    %c0_i32 = arith.constant 0 : i32
    %c0_i32_0 = arith.constant 0 : i32
    %c0_i32_1 = arith.constant 0 : i32
    return %arg0, %arg1, %c0_i32, %c0_i32_0 : i32, i32, i32, i32
  }
}

</mosaic_0001>

<bundles_post_ra>
// kernel: tpu_custom_call.1
= control target key start
LH: loop header
LB: loop body
LE: loop exit
PB: predicated region body
PF: predicated region fallthrough
CT: control target
= control target key end

     0   :  { %9 = vsyncpa [#allocation3], 0  ;;  %s1793_s0 = inlined_call_operand.vmem [shape: bf16[2,16,16,8], index: 0, kind: input, shape index: {}]   ;;  %s1794_s1 = inlined_call_operand.vmem [shape: bf16[3,24,32], index: 1, kind: input, shape index: {}]   ;;  %s1795_s2 = inlined_call_operand.vmem [shape: f32[1,32], index: 2, kind: input, shape index: {}]   ;;  %s1796_s3 = inlined_call_operand.vmem [shape: f32[1,32], index: 3, kind: input, shape index: {}]   ;;  %s1797_s4 = inlined_call_operand.hbm [shape: bf16[2,16,16,32], index: 4, kind: output, shape index: {}]  }
   0x1   :  { %11 = vsyncpa [#allocation3 + $0x1], 0  ;;  %s1292_s15 = smov 0   ;;  %s1294_s16 = smov 0  }
   0x2   :  { %s1296_s17 = smov 0   ;;  %s1298_s18 = smov 0  }
   0x3   :  { %s1300_s19 = smov 0   ;;  %s1302_s20 = smov 0  }
   0x4   :  { %s1304_s21 = smov 0   ;;  %s1306_s22 = smov 0  }
   0x5 LB: > { %s970_s23 = sadd.s32 4294967295, %s1261_s22   ;;  %s971_s24 = sadd.s32 4294967294, %s1261_s22   ;;  %s1261_s22 = sphi %s1306_s22, %s17_s22   ;;  %s1257_s21 = sphi %s1304_s21, %s1810_s21   ;;  %s1253_s20 = sphi %s1302_s20, %s1809_s20   ;;  %s1249_s19 = sphi %s1300_s19, %s1808_s19   ;;  %s1245_s18 = sphi %s1298_s18, %s1807_s18   ;;  %s1241_s17 = sphi %s1296_s17, %s1806_s17   ;;  %s1237_s16 = sphi %s1294_s16, %s1805_s16   ;;  %s1233_s15 = sphi %s1292_s15, %s1804_s15  }
   0x6   : > { %s26_s25 = sadd.s32 1, %s1253_s20  ;;  %s29_s26 = sadd.s32 1, %s1257_s21 }
   0x7   : > { %p27_p0 = scmp.ge.s32.totalorder %s26_s25, 2  ;;  %p137_p1 = scmp.ne.s32.totalorder %s1241_s17, %s1237_s16 }
   0x8   : > { %p138_p2 = scmp.eq.s32.totalorder %s970_s23, 3  ;;  %p143_p5 = scmp.ne.s32.totalorder %s1237_s16, %s1233_s15 }
   0x9   : > { %s1812_s25 = smov (%p27_p0, %s26_s25), 0  ;;  %s1814_s26 = smov (!%p27_p0, %s29_s26), %s1257_s21 }
   0xa   : > { %s123_s27 = ssub.s32 %s1253_s20, %s1812_s25  ;;  %p1343_p3 = por %p138_p2, %p137_p1 }
   0xb   : > { %p31_p4 = scmp.ge.s32.totalorder %s1814_s26, 2  ;;  %p144_p6 = scmp.eq.s32.totalorder %s971_s24, 3 }
   0xc   : > { %p974_p7 = scmp.ge.s32.totalorder %s1261_s22, 1  ;;  %p179_p9 = scmp.lt.s32.totalorder %s1261_s22, 5 }
   0xd   : > { %s1816_s26 = smov (%p31_p4, %s1814_s26), 0  ;;  %p1352_p8 = por %p144_p6, %p143_p5 }
   0xe   : > { %s122_s30 = ssub.s32 %s1257_s21, %s1816_s26  ;;  %s127_s5 = sadd.s32 1, %s1241_s17 }
   0xf   : > { %s124_s6 = sor.u32 %s123_s27, %s122_s30  ;;  %p180_p10 = pnand %p974_p7, %p179_p9 }
  0x10   : > { %p125_p11 = scmp.eq.s32.totalorder %s124_s6, 0  ;;  %p205_p12 = scmp.lt.s32.totalorder (!%p180_p10), %s1249_s19, 1 }
  0x11   : > { %183 = sbr.rel (%p180_p10) target bundleno = 397 (0x18d), region = 36  ;;  %s1069_s8 = sshll.u32 (!%p180_p10), %s1245_s18, 6 }
  0x12   : > { %s1361_s7 = scalar_select %p125_p11, %s1241_s17, %s127_s5  }
  0x13   : > { %s978_s10 = sshll.u32 (!%p180_p10), %s1245_s18, 3  ;;  %p248_p13 = scmp.eq.s32.totalorder (!%p180_p10), %s1245_s18, 0 }
  0x14   : > { %s981_s12 = sadd.s32 (!%p180_p10), 4294967295, %s978_s10  ;;  %s1263_s30 = smov (!%p180_p10), 8  }
  0x15   : > { %p233_p0 = scmp.gt.s32.totalorder (!%p180_p10), %s981_s12, 0  ;;  %p254_p2 = scmp.eq.s32.totalorder (!%p180_p10), %s1245_s18, 1 }
  0x16   : > { %s206_s9 = scalar_select %p205_p12, %s1249_s19, 1  ;;  %vm399_vm0 = vcmask 1047552   ;;  %vm400_vm1 = vsmask.f32 7424  ;;  %vm553_vm5 = vcmask 1043456   ;;  %vm364_vm6 = vcmask 1040384  }
  0x17   : > { %s1818_s12 = smov (!%p233_p0, %s981_s12), 0  ;;  %vm1397_vm2 = vmand %vm399_vm0, %vm400_vm1  ;;  %v1020_v9 = vld [vmem:[%s1794_s1 + $0x14] sm:$0xf]  ;;  %vm365_vm7 = vsmask.f32 256  ;;  %vm450_vm9 = vcmask 64512  }
  0x18   : > { %s1067_s11 = sshll.u32 %s206_s9, 7  ;;  %s1078_s5 = sshll.u32 %s1818_s12, 3  ;;  %vm1547_vm8 = vmand %vm364_vm6, %vm365_vm7  ;;  %vm475_vm10 = vcmask 130048   ;;  %vm536_vm11 = vcmask 195584   ;;  %vm852_vm12 = vcmask 257024  }
  0x19   : > { %s1373_s23 = scalar_lea.vmem %s1793_s0, %s1067_s11  ;;  %s240_s9 = sadd.s32 8, %s978_s10 }
  0x1a   : > { %s1376_s24 = scalar_lea.vmem %s1373_s23, %s1069_s8  ;;  %s237_s6 = scalar_lea.vmem %s1373_s23, %s1078_s5 }
  0x1b   : > { %v1379_v0 = vld [vmem:[%s1376_s24 + $0x8] sm:$0xff]  ;;  %v1382_v1 = vld [vmem:[%s1376_s24 + $0x30] sm:$0xff]  ;;  %v1385_v2 = vld [vmem:[%s1376_s24] sm:$0xff]  ;;  %s249_s27 = scalar_select %p248_p13, 1, 0 }
  0x1c   : > { %414 = vrot.lane.b32.xlu0 %v1379_v0, %s1263_s30  ;;  %v315_v3 = vshrl.u32 %v1379_v0, 16  ;;  %v318_v4 = vshll.u32 %v1379_v0, 16  ;;  %v353_v5 = vshll.u32 %v1382_v1, 16  ;;  %412 = vrot.lane.b32.xlu2 %v1385_v2, %s1263_s30  ;;  %v238_v8 = vld [vmem:[%s237_s6] sm:$0xf]  ;;  %v350_v10 = vshrl.u32 %v1382_v1, 16 }
  0x1d   : > { %v250_v6 = vstv %s249_s27  ;;  %v239_v11 = vld [vmem:[%s237_s6 + $0x4] sm:$0xf]  ;;  %s1264_s8 = smov 16   ;;  %v311_v21 = vshll.u32 %v1385_v2, 16  ;;  %v1417_v22 = vld [vmem:[%s1376_s24 + $0x38] sm:$0xff]  ;;  %v308_v28 = vshrl.u32 %v1385_v2, 16 }
  0x1e   : > { %v379_v7 = vrot.slane %v318_v4, 1  ;;  %vm251_vm3 = vcmp.eq.s32.totalorder %v250_v6, 1  ;;  %v389_v13 = vrot.slane %v353_v5, 1  ;;  %v504_v25 = vshll.u32 %v1417_v22, 16  ;;  %v1434_v30 = vld [vmem:[%s1376_s24 + $0x10] sm:$0xff]  ;;  %p241_p1 = scmp.lt.s32.totalorder %s240_s9, 15 }
  0x1f   : > { %v252_v14 = vsel %vm251_vm3, 0, %v238_v8  ;;  %v253_v15 = vsel %vm251_vm3, 0, %v239_v11  ;;  %v377_v29 = vrot.slane %v311_v21, 1  ;;  %v501_v32 = vshrl.u32 %v1417_v22, 16  ;;  %v1450_v37 = vld [vmem:[%s1376_s24 + $0x18] sm:$0xff]  ;;  %v1463_v43 = vld [vmem:[%s1376_s24 + $0x28] sm:$0xff] }
  0x20   : > { %v380_v12 = vor.u32 %v379_v7, %v315_v3  ;;  %v276_v16 = vunpack.c.l.b16 %v252_v14  ;;  %v277_v17 = vunpack.c.l.b16 %v253_v15  ;;  %v390_v20 = vor.u32 %v389_v13, %v350_v10  ;;  %s1820_s9 = smov (!%p241_p1, %s240_s9), 15  ;;  %v1477_v49 = vld [vmem:[%s1376_s24 + $0x20] sm:$0xff]  ;;  %s202_s24 = sand.u32 1, %s1237_s16  }
  0x21   : > { %v509_v33 = vrot.slane %v504_v25, 1  ;;  %v378_v35 = vor.u32 %v377_v29, %v308_v28  ;;  %v325_v36 = vshll.u32 %v1434_v30, 16  ;;  %v332_v39 = vshll.u32 %v1450_v37, 16  ;;  %s255_s10 = scalar_select %p254_p2, 1, 0 }
  0x22   : > { %v404_v18 = vsel %vm1397_vm2, %v380_v12, 0  ;;  %v1409_v19 = vpack.c.b16 %v277_v17, %v276_v16  ;;  %v409_v27 = vsel %vm1397_vm2, %v390_v20, 0  ;;  %v322_v41 = vshrl.u32 %v1434_v30, 16  ;;  %s1079_s11 = sshll.u32 %s1820_s9, 3  ;;  %v1047_v20 = vld [vmem:[%s1794_s1 + $0x20] sm:$0xf] }
  0x23   : > { %438 = vrot.lane.b32.xlu1 %v404_v18, %s1264_s8  ;;  %v510_v38 = vor.u32 %v509_v33, %v501_v32  ;;  %v403_v40 = vsel %vm1397_vm2, %v378_v35, 0  ;;  %v381_v42 = vrot.slane %v325_v36, 1  ;;  %v329_v45 = vshrl.u32 %v1450_v37, 16  ;;  %s245_s12 = scalar_lea.vmem %s1373_s23, %s1079_s11  ;;  %s975_s27 = sshll.u32 %s202_s24, 6 }
  0x24   : > { %424 = vrot.lane.b32.xlu0 %v1382_v1, %s1263_s30  ;;  %v301_v23 = vshrl.u32 %v1409_v19, 16  ;;  %v304_v24 = vshll.u32 %v1409_v19, 16  ;;  %410 = vrot.lane.b32.xlu2 %v1409_v19, %s1263_s30  ;;  %v383_v46 = vrot.slane %v332_v39, 1  ;;  %v256_v47 = vstv %s255_s10  ;;  %v246_v53 = vld [vmem:[%s245_s12] sm:$0xf]  ;;  %s1083_s5 = sshll.u32 %s1245_s18, 4 }
  0x25   : > { %v512_v44 = vsel %vm1397_vm2, %v510_v38, 0  ;;  %v382_v48 = vor.u32 %v381_v42, %v322_v41  ;;  %v346_v50 = vshll.u32 %v1463_v43, 16  ;;  %v339_v52 = vshll.u32 %v1477_v49, 16  ;;  %v247_v54 = vld [vmem:[%s245_s12 + $0x4] sm:$0xf]  ;;  %s1063_s6 = sshll.u32 %s1249_s19, 5 }
  0x26   : > { %v375_v26 = vrot.slane %v304_v24, 1  ;;  %v384_v51 = vor.u32 %v383_v46, %v329_v45  ;;  %vm257_vm4 = vcmp.eq.s32.totalorder %v256_v47, 1  ;;  %v343_v56 = vshrl.u32 %v1463_v43, 16  ;;  %v1081_v46 = vld [vmem:[%s1794_s1 + $0xc] sm:$0xff]  ;;  %v1080_v47 = vld [vmem:[%s1794_s1] sm:$0xff]  ;;  %s870_s13 = scalar_lea.sflag [#allocation3], %s202_s24 }
  0x27   : > { %v405_v55 = vsel %vm1397_vm2, %v382_v48, 0  ;;  %v387_v57 = vrot.slane %v346_v50, 1  ;;  %v258_v58 = vsel %vm257_vm4, 0, %v246_v53  ;;  %v259_v59 = vsel %vm257_vm4, 0, %v247_v54 }
  0x28   : > { %v376_v31 = vor.u32 %v375_v26, %v301_v23  ;;  %v406_v60 = vsel %vm1397_vm2, %v384_v51, 0  ;;  %v336_v61 = vshrl.u32 %v1477_v49, 16  ;;  %v385_v62 = vrot.slane %v339_v52, 1 }
  0x29   : > { %v671_v63 = vunpack.c.l.b16 %v258_v58  ;;  %v672_v6 = vunpack.c.l.b16 %v259_v59  ;;  %v388_v7 = vor.u32 %v387_v57, %v343_v56  ;;  %v706_v26 = vunpack.c.l.b16 %v1047_v20 }
  0x2a   : > { %v402_v34 = vsel %vm1397_vm2, %v376_v31, 0  ;;  %v386_v8 = vor.u32 %v385_v62, %v336_v61  ;;  %v1082_v31 = vld [vmem:[%s1794_s1 + $0x18] sm:$0xff]  ;;  %v532_v33 = vunpack.c.l.b16 %v1020_v9  ;;  %v317_v48 = vrot.slane %v315_v3, 7 }
  0x2b   : > { %448 = vrot.lane.b32.xlu1 %v409_v27, %s1264_s8  ;;  %v1502_v11 = vpack.c.b16 %v672_v6, %v671_v63  ;;  %v408_v12 = vsel %vm1397_vm2, %v388_v7, 0  ;;  %v708_v27 = vpack.c.b16 %v706_v26, %v706_v26  ;;  %v352_v57 = vrot.slane %v350_v10, 7 }
  0x2c   : > { %434 = vrot.lane.b32.xlu0 %v402_v34, %s1264_s8  ;;  %416 = vrot.lane.b32.xlu2 %v1434_v30, %s1263_s30  ;;  %v407_v13 = vsel %vm1397_vm2, %v386_v8, 0  ;;  %v494_v34 = vld [vmem:[%s1794_s1 + $0x8] sm:$0xf]  ;;  %v534_v38 = vpack.c.b16 %v532_v33, %v532_v33  ;;  %v320_v53 = vor.u32 %v318_v4, %v317_v48  ;;  %v303_v3 = vrot.slane %v301_v23, 7 }
  0x2d   : > { %v678_v14 = vshll.u32 %v1502_v11, 16  ;;  %v675_v15 = vshrl.u32 %v1502_v11, 16  ;;  %v713_v29 = vsel %vm553_vm5, %v708_v27, 0  ;;  %v611_v35 = vunpack.c.l.b16 %v494_v34 }
  0x2e   : > { %721 = vmatpush.bf16.msra.mxu2 %v713_v29  ;;  %v555_v42 = vsel %vm553_vm5, %v534_v38, 0  ;;  %v369_v58 = vsel %vm1547_vm8, 0, %v320_v53  ;;  %v355_v0 = vor.u32 %v353_v5, %v352_v57  ;;  %v310_v1 = vrot.slane %v308_v28, 7 }
  0x2f   : > { %v683_v16 = vrot.slane %v678_v14, 1  ;;  %1084 = vmatpush.bf16.msra.mxu3 %v555_v42  ;;  %563 = vmatpush.bf16.msra.mxu0 %v555_v42  ;;  %v503_v7 = vrot.slane %v501_v32, 7 }
  0x30   : > { %v374_v23 = vsel %vm1547_vm8, 0, %v355_v0  ;;  %v313_v8 = vor.u32 %v311_v21, %v310_v1 }
  0x31   : > { %v684_v17 = vor.u32 %v683_v16, %v675_v15  ;;  %v506_v21 = vor.u32 %v504_v25, %v503_v7 }
  0x32   : > { %722 = vmatpush.bf16.msra.mxu2 %v1082_v31  ;;  %v368_v2 = vsel %vm1547_vm8, 0, %v313_v8 }
  0x33   : > { %436 = vrot.lane.b32.xlu1 %v403_v40, %s1264_s8  ;;  %v686_v18 = vsel %vm1397_vm2, %v684_v17, 0  ;;  %v613_v40 = vpack.c.b16 %v611_v35, %v611_v35  ;;  %1085 = vmatpush.bf16.msra.mxu3 %v1081_v46  ;;  %v324_v17 = vrot.slane %v322_v41, 7  ;;  %v508_v27 = vsel %vm1547_vm8, 0, %v506_v21 }
  0x34   : > { %513 = vrot.lane.b32.xlu0 %v1417_v22, %s1263_s30  ;;  %516 = vrot.lane.b32.xlu2 %v512_v44, %s1264_s8  ;;  %v331_v35 = vrot.slane %v329_v45, 7 }
  0x35   : > { %v618_v44 = vsel %vm553_vm5, %v613_v40, 0  ;;  %564 = vmatpush.bf16.msra.mxu0 %v1081_v46  ;;  %v327_v20 = vor.u32 %v325_v36, %v324_v17  ;;  %v345_v36 = vrot.slane %v343_v56, 7 }
  0x36   : > { %626 = vmatpush.bf16.msra.mxu1 %v618_v44  ;;  %v334_v40 = vor.u32 %v332_v39, %v331_v35 }
  0x37   : > { %1086 = vmatpush.bf16.msrb.mxu3 %v618_v44  ;;  %v370_v22 = vsel %vm1547_vm8, 0, %v327_v20  ;;  %v348_v38 = vor.u32 %v346_v50, %v345_v36 }
  0x38   : > { %v371_v44 = vsel %vm1547_vm8, 0, %v334_v40 }
  0x39   : > { %v373_v56 = vsel %vm1547_vm8, 0, %v348_v38 }
  0x3a   : > { %627 = vmatpush.bf16.msra.mxu1 %v1080_v47 }
  0x3b   : > { %440 = vrot.lane.b32.xlu1 %v405_v55, %s1264_s8  ;;  %1087 = vmatpush.bf16.msrb.mxu3 %v1080_v47 }
  0x3c   : > { %418 = vrot.lane.b32.xlu0 %v1450_v37, %s1263_s30  ;;  %442 = vrot.lane.b32.xlu2 %v406_v60, %s1264_s8  ;;  %v306_v60 = vor.u32 %v304_v24, %v303_v3  ;;  %v338_v37 = vrot.slane %v336_v61, 7 }
  0x3e   : > { %v367_v6 = vsel %vm1547_vm8, 0, %v306_v60  ;;  %v341_v50 = vor.u32 %v339_v52, %v338_v37 }
  0x43   : > { %422 = vrot.lane.b32.xlu1 %v1463_v43, %s1263_s30 }
  0x44   : > { %446 = vrot.lane.b32.xlu0 %v408_v12, %s1264_s8  ;;  %444 = vrot.lane.b32.xlu2 %v407_v13, %s1264_s8 }
  0x4b   : > { %420 = vrot.lane.b32.xlu1 %v1477_v49, %s1263_s30 }
  0x4c   : > { %687 = vrot.lane.b32.xlu0 %v1502_v11, %s1263_s30  ;;  %s1675_s30 = scalar_lea.vmem [#allocation2], %s975_s27 }
  0x4d   : > { %s885_s11 = sshll.u32 %s1675_s30, 4  ;;  %s886_s11 = int_to_ptr.vmem [resolvable:$true] %s885_s11 }
  0x53   : > { %690 = vrot.lane.b32.xlu1 %v686_v18, %s1264_s8  ;;  %s882_s8 = sadd.s32 %s1083_s5, %s1063_s6  ;;  %s1187_s6 = scalar_lea.hbm %s1797_s4, 256 }
  0x54   : > { %s1064_s18 = sshll.u32 %s882_s8, 2 }
  0x55   : > { %s884_s10 = scalar_lea.hbm %s1797_s4, %s1064_s18 }
  0x56   : > { %s887_s12 = sshll.u32 %s884_s10, 4  ;;  %s888_s12 = int_to_ptr.hbm [resolvable:$true] %s887_s12 }
  0x57   : > { %s1181_s14 = sshra.s32 %s888_s12, 4  ;;  %s1182_s14 = int_to_ptr.hbm [resolvable:$true] %s1181_s14 }
  0x58   : > { %s1183_s23 = scalar_lea.hbm %s1182_s14, 64  ;;  %p1188_p7 = scmp.lt.s32.totalorder %s1182_s14, %s1797_s4 }
  0x59   : > { %p1184_p4 = scmp.ne.s32.totalorder %s1182_s14, %s1183_s23  ;;  %p1189_p9 = scmp.lt.s32.totalorder %s1187_s6, %s1183_s23 }
  0x5b   : > { %p1185_p5 = pnand %p1184_p4, %p1343_p3  ;;  %p1190_p10 = por %p1189_p9, %p1188_p7 }
  0x5d   : > { %p1186_p6 = pneg %p1185_p5 }
  0x5f   : > { %p1191_p11 = pnand %p1190_p10, %p1186_p6 }
  0x76   : > { %v413_v51 = vpop.permute.xlu2 %412 }
  0x77   : > { %v456_v32 = vsel %vm450_vm9, %v368_v2, %v413_v51  ;;  %v677_v51 = vrot.slane %v675_v15, 7 }
  0x79   : > { %v680_v61 = vor.u32 %v678_v14, %v677_v51 }
  0x7b   : > { %v682_v49 = vsel %vm1547_vm8, 0, %v680_v61 }
  0x7e   : > { %v411_v62 = vpop.permute.xlu2 %410 }
  0x7f   : > { %v453_v19 = vsel %vm450_vm9, %v367_v6, %v411_v62  ;;  %v1661_v62 = vld [vmem:[%s1795_s2] ss:$0 sm:$0xff] }
  0x86   : > { %v417_v16 = vpop.permute.xlu2 %416 }
  0x8e   : > { %v415_v55 = vpop.permute.xlu0 %414  ;;  %v517_v9 = vpop.permute.xlu2 %516 }
  0x8f   : > { %v459_v59 = vsel %vm450_vm9, %v369_v58, %v415_v55  ;;  %v372_v55 = vsel %vm1547_vm8, 0, %v341_v50 }
  0x95   : > { %v439_v4 = vpop.permute.xlu1 %438 }
  0x96   : > { %v425_v10 = vpop.permute.xlu0 %424  ;;  %v481_v63 = vsel %vm475_vm10, %v459_v59, %v439_v4  ;;  %v443_v48 = vpop.permute.xlu2 %442 }
  0x97   : > { %1052 = vmatmul.msk.bf16.vlgmr.msra.gmra.mxu2 %vm536_vm11, %v481_v63  ;;  %v474_v5 = vsel %vm450_vm9, %v374_v23, %v425_v10  ;;  %v1666_v23 = vld [vmem:[%s1796_s3] ss:$0 sm:$0xff] }
  0x9d   : > { %v449_v24 = vpop.permute.xlu1 %448 }
  0x9e   : > { %v435_v12 = vpop.permute.xlu0 %434  ;;  %v1577_v13 = vsel %vm475_vm10, %v474_v5, %v449_v24  ;;  %v445_v3 = vpop.permute.xlu2 %444 }
  0x9f   : > { %1031 = vmatmul.msk.bf16.vlgmr.msra.gmra.mxu3 %vm536_vm11, %v1577_v13  ;;  %v477_v28 = vsel %vm475_vm10, %v453_v19, %v435_v12 }
  0xa0   : > { %1037 = vmatmul.msk.bf16.vlgmr.msra.gmra.mxu1 %vm536_vm11, %v477_v28  ;;  %1088 = vmatpush.bf16.msra.mxu3 %v713_v29 }
  0xa4   : > { %1089 = vmatpush.bf16.msra.mxu3 %v1082_v31  ;;  %v462_v31 = vsel %vm450_vm9, %v370_v22, %v417_v16 }
  0xa5   : > { %v437_v18 = vpop.permute.xlu1 %436 }
  0xa6   : > { %v479_v26 = vsel %vm475_vm10, %v456_v32, %v437_v18  ;;  %v514_v29 = vpop.permute.xlu0 %513 }
  0xa7   : > { %1025 = vmatmul.msk.bf16.vlgmr.msra.gmra.mxu0 %vm536_vm11, %v479_v26  ;;  %v520_v41 = vsel %vm450_vm9, %v508_v27, %v514_v29 }
  0xa8   : > { %v522_v25 = vsel %vm475_vm10, %v520_v41, %v517_v9 }
  0xad   : > { %v441_v30 = vpop.permute.xlu1 %440 }
  0xae   : > { %v483_v33 = vsel %vm475_vm10, %v462_v31, %v441_v30  ;;  %v419_v34 = vpop.permute.xlu0 %418 }
  0xaf   : > { %1032 = vmatmul.msk.bf16.gmra.mxu3 %vm536_vm11, %v522_v25  ;;  %1053 = vmatmul.msk.bf16.gmra.mxu2 %vm536_vm11, %v483_v33  ;;  %v465_v47 = vsel %vm450_vm9, %v371_v44, %v419_v34 }
  0xb0   : > { %1038 = vmatmul.msk.bf16.gmra.mxu1 %vm536_vm11, %v479_v26  ;;  %v485_v39 = vsel %vm475_vm10, %v465_v47, %v443_v48 }
  0xb5   : > { %v423_v42 = vpop.permute.xlu1 %422 }
  0xb6   : > { %v471_v46 = vsel %vm450_vm9, %v373_v56, %v423_v42  ;;  %v447_v45 = vpop.permute.xlu0 %446 }
  0xb7   : > { %1026 = vmatmul.msk.bf16.gmra.mxu0 %vm536_vm11, %v481_v63  ;;  %v489_v43 = vsel %vm475_vm10, %v471_v46, %v447_v45 }
  0xbd   : > { %v421_v53 = vpop.permute.xlu1 %420 }
  0xbe   : > { %v688_v57 = vpop.permute.xlu0 %687  ;;  %v468_v58 = vsel %vm450_vm9, %v372_v55, %v421_v53 }
  0xbf   : > { %1043 = vmatmul.msk.bf16.vlgmr.msrb.gmra.mxu3 %vm536_vm11, %v489_v43  ;;  %1054 = vmatmul.msk.bf16.gmra.mxu2 %vm536_vm11, %v485_v39  ;;  %v694_v52 = vsel %vm450_vm9, %v682_v49, %v688_v57  ;;  %v487_v15 = vsel %vm475_vm10, %v468_v58, %v445_v3 }
  0xc0   : > { %1039 = vmatmul.msk.bf16.gmra.mxu1 %vm536_vm11, %v481_v63 }
  0xc5   : > { %v691_v59 = vpop.permute.xlu1 %690 }
  0xc6   : > { %v696_v0 = vsel %vm475_vm10, %v694_v52, %v691_v59 }
  0xc7   : > { %1027 = vmatmul.msk.bf16.gmra.mxu0 %vm536_vm11, %v483_v33 }
  0xcf   : > { %1044 = vmatmul.msk.bf16.gmra.mxu3 %vm536_vm11, %v1577_v13  ;;  %1055 = vmatmul.msk.bf16.gmra.mxu2 %vm536_vm11, %v487_v15 }
  0xd0   : > { %1040 = vmatmul.msk.bf16.gmra.mxu1 %vm536_vm11, %v483_v33 }
  0xd7   : > { %1028 = vmatmul.msk.bf16.gmra.mxu0 %vm536_vm11, %v485_v39 }
  0xdf   : > { %1056 = vmatmul.msk.bf16.gmra.mxu2 %vm536_vm11, %v489_v43  ;;  %1058 = vmatmul.msk.bf16.vlgmr.msra.gmra.mxu3 %vm536_vm11, %v522_v25 }
  0xe0   : > { %1041 = vmatmul.msk.bf16.gmra.mxu1 %vm536_vm11, %v485_v39 }
  0xe7   : > { %1029 = vmatmul.msk.bf16.gmra.mxu0 %vm536_vm11, %v487_v15 }
  0xef   : > { %1057 = vmatmul.msk.bf16.gmra.mxu2 %vm536_vm11, %v1577_v13  ;;  %1059 = vmatmul.msk.bf16.gmra.mxu3 %vm536_vm11, %v696_v0 }
  0xf0   : > { %1042 = vmatmul.msk.bf16.gmra.mxu1 %vm536_vm11, %v487_v15 }
  0xf7   : > { %1030 = vmatmul.msk.bf16.gmra.mxu0 %vm536_vm11, %v489_v43 }
 0x11a   : > { %v724_v14 = vpop.f32.mrf.mxu2 }
 0x11d   : > { %v629_v11 = vpop.f32.mrf.mxu1 }
 0x122   : > { %v1656_v54 = vpop.f32.mrf.mxu3  ;;  %v726_v1 = vpop.f32.mrf.mxu2 }
 0x124   : > { %v566_v4 = vpop.f32.mrf.mxu0 }
 0x125   : > { %v630_v60 = vadd.f32 %v629_v11, %v566_v4  ;;  %v631_v10 = vpop.f32.mrf.mxu1 }
 0x127   : > { %v764_v63 = vadd.f32 %v724_v14, %v630_v60 }
 0x129   : > { %v784_v6 = vmul.f32 %v1661_v62, %v764_v63 }
 0x12a   : > { %v1670_v5 = vpop.f32.mrf.mxu3 }
 0x12b   : > { %v804_v19 = vadd.f32 %v1666_v23, %v784_v6 }
 0x12c   : > { %v568_v24 = vpop.f32.mrf.mxu0 }
 0x12d   : > { %v820_v7 = vmax.f32 %v804_v19, 0.0  ;;  %v632_v8 = vadd.f32 %v631_v10, %v568_v24  ;;  %v634_v12 = vpop.f32.mrf.mxu1 }
 0x12f   : > { %v836_v13 = vpack.c.bf16 %v820_v7, %v820_v7  ;;  %v765_v28 = vadd.f32 %v726_v1, %v632_v8 }
 0x131   : > { %853 = vst.msk [vmem:[%s1675_s30] sm:$0xf] %vm852_vm12, %v836_v13  ;;  %v785_v16 = vmul.f32 %v1661_v62, %v765_v28 }
 0x132   : > { %v1680_v17 = vpop.f32.mrf.mxu3  ;;  %v729_v2 = vpop.f32.mrf.mxu2 }
 0x133   : > { %v805_v21 = vadd.f32 %v1666_v23, %v785_v16 }
 0x134   : > { %v571_v32 = vpop.f32.mrf.mxu0 }
 0x135   : > { %v821_v18 = vmax.f32 %v805_v21, 0.0  ;;  %v635_v20 = vadd.f32 %v634_v12, %v571_v32  ;;  %v636_v26 = vpop.f32.mrf.mxu1 }
 0x137   : > { %v837_v27 = vpack.c.bf16 %v821_v18, %v821_v18  ;;  %v766_v29 = vadd.f32 %v729_v2, %v635_v20 }
 0x139   : > { %854 = vst.msk [vmem:[%s1675_s30 + $0x4] sm:$0xf] %vm852_vm12, %v837_v27  ;;  %v786_v41 = vmul.f32 %v1661_v62, %v766_v29 }
 0x13a   : > { %v1686_v9 = vpop.f32.mrf.mxu3  ;;  %v731_v22 = vpop.f32.mrf.mxu2 }
 0x13b   : > { %v806_v25 = vadd.f32 %v1666_v23, %v786_v41 }
 0x13c   : > { %v573_v31 = vpop.f32.mrf.mxu0 }
 0x13d   : > { %v822_v30 = vmax.f32 %v806_v25, 0.0  ;;  %v637_v36 = vadd.f32 %v636_v26, %v573_v31  ;;  %v639_v33 = vpop.f32.mrf.mxu1 }
 0x13f   : > { %v838_v34 = vpack.c.bf16 %v822_v30, %v822_v30  ;;  %v767_v35 = vadd.f32 %v731_v22, %v637_v36 }
 0x141   : > { %855 = vst.msk [vmem:[%s1675_s30 + $0x8] sm:$0xf] %vm852_vm12, %v838_v34  ;;  %v787_v38 = vmul.f32 %v1661_v62, %v767_v35 }
 0x142   : > { %v659_v40 = vpop.f32.mrf.mxu3  ;;  %v734_v56 = vpop.f32.mrf.mxu2 }
 0x143   : > { %v807_v42 = vadd.f32 %v1666_v23, %v787_v38  ;;  %v660_v16 = vadd.f32 %v659_v40, %v1656_v54 }
 0x144   : > { %v576_v44 = vpop.f32.mrf.mxu0 }
 0x145   : > { %v823_v46 = vmax.f32 %v807_v42, 0.0  ;;  %v640_v45 = vadd.f32 %v639_v33, %v576_v44  ;;  %v641_v47 = vpop.f32.mrf.mxu1 }
 0x147   : > { %v839_v48 = vpack.c.bf16 %v823_v46, %v823_v46  ;;  %v768_v43 = vadd.f32 %v734_v56, %v640_v45 }
 0x149   : > { %856 = vst.msk [vmem:[%s1675_s30 + $0xc] sm:$0xf] %vm852_vm12, %v839_v48  ;;  %v788_v37 = vmul.f32 %v1661_v62, %v768_v43 }
 0x14a   : > { %v661_v39 = vpop.f32.mrf.mxu3  ;;  %v736_v50 = vpop.f32.mrf.mxu2 }
 0x14b   : > { %v808_v51 = vadd.f32 %v1666_v23, %v788_v37  ;;  %v662_v30 = vadd.f32 %v661_v39, %v1670_v5 }
 0x14c   : > { %v578_v53 = vpop.f32.mrf.mxu0 }
 0x14d   : > { %v824_v55 = vmax.f32 %v808_v51, 0.0  ;;  %v642_v61 = vadd.f32 %v641_v47, %v578_v53  ;;  %v644_v57 = vpop.f32.mrf.mxu1 }
 0x14f   : > { %v840_v58 = vpack.c.bf16 %v824_v55, %v824_v55  ;;  %v769_v3 = vadd.f32 %v736_v50, %v642_v61 }
 0x151   : > { %857 = vst.msk [vmem:[%s1675_s30 + $0x10] sm:$0xf] %vm852_vm12, %v840_v58  ;;  %v789_v49 = vmul.f32 %v1661_v62, %v769_v3 }
 0x152   : > { %v664_v52 = vpop.f32.mrf.mxu3  ;;  %v739_v59 = vpop.f32.mrf.mxu2 }
 0x153   : > { %v809_v15 = vadd.f32 %v1666_v23, %v789_v49  ;;  %v665_v43 = vadd.f32 %v664_v52, %v1680_v17 }
 0x154   : > { %v581_v0 = vpop.f32.mrf.mxu0 }
 0x155   : > { %v825_v11 = vmax.f32 %v809_v15, 0.0  ;;  %v645_v14 = vadd.f32 %v644_v57, %v581_v0  ;;  %v646_v4 = vpop.f32.mrf.mxu1 }
 0x157   : > { %v841_v60 = vpack.c.bf16 %v825_v11, %v825_v11  ;;  %v770_v10 = vadd.f32 %v739_v59, %v645_v14 }
 0x159   : > { %858 = vst.msk [vmem:[%s1675_s30 + $0x14] sm:$0xf] %vm852_vm12, %v841_v60  ;;  %v790_v63 = vmul.f32 %v1661_v62, %v770_v10 }
 0x15a   : > { %v666_v6 = vpop.f32.mrf.mxu3  ;;  %v741_v1 = vpop.f32.mrf.mxu2 }
 0x15b   : > { %v810_v19 = vadd.f32 %v1666_v23, %v790_v63  ;;  %v667_v0 = vadd.f32 %v666_v6, %v1686_v9 }
 0x15c   : > { %v583_v24 = vpop.f32.mrf.mxu0 }
 0x15d   : > { %v826_v7 = vmax.f32 %v810_v19, 0.0  ;;  %v647_v8 = vadd.f32 %v646_v4, %v583_v24  ;;  %v649_v12 = vpop.f32.mrf.mxu1 }
 0x15f   : > { %v842_v13 = vpack.c.bf16 %v826_v7, %v826_v7  ;;  %v771_v28 = vadd.f32 %v741_v1, %v647_v8 }
 0x161   : > { %859 = vst.msk [vmem:[%s1675_s30 + $0x18] sm:$0xf] %vm852_vm12, %v842_v13  ;;  %v791_v2 = vmul.f32 %v1661_v62, %v771_v28 }
 0x162   : > { %v744_v21 = vpop.f32.mrf.mxu2  ;;  %v754_v32 = vpop.f32.mrf.mxu3 }
 0x163   : > { %v811_v18 = vadd.f32 %v1666_v23, %v791_v2  ;;  %v776_v20 = vadd.f32 %v754_v32, %v660_v16 }
 0x164   : > { %v586_v26 = vpop.f32.mrf.mxu0 }
 0x165   : > { %v827_v27 = vmax.f32 %v811_v18, 0.0  ;;  %v796_v29 = vmul.f32 %v1661_v62, %v776_v20  ;;  %v650_v41 = vadd.f32 %v649_v12, %v586_v26  ;;  %v651_v31 = vpop.f32.mrf.mxu1 }
 0x167   : > { %v843_v22 = vpack.c.bf16 %v827_v27, %v827_v27  ;;  %v816_v25 = vadd.f32 %v1666_v23, %v796_v29  ;;  %v772_v54 = vadd.f32 %v744_v21, %v650_v41 }
 0x169   : > { %860 = vst.msk [vmem:[%s1675_s30 + $0x1c] sm:$0xf] %vm852_vm12, %v843_v22  ;;  %v832_v36 = vmax.f32 %v816_v25, 0.0  ;;  %v792_v33 = vmul.f32 %v1661_v62, %v772_v54 }
 0x16a   : > { %v746_v34 = vpop.f32.mrf.mxu2  ;;  %v756_v35 = vpop.f32.mrf.mxu3 }
 0x16b   : > { %v848_v38 = vpack.c.bf16 %v832_v36, %v832_v36  ;;  %v812_v40 = vadd.f32 %v1666_v23, %v792_v33  ;;  %v777_v56 = vadd.f32 %v756_v35, %v662_v30 }
 0x16c   : > { %v588_v42 = vpop.f32.mrf.mxu0 }
 0x16d   : > { %865 = vst.msk [vmem:[%s1675_s30 + $0x30] sm:$0xf] %vm852_vm12, %v848_v38  ;;  %v828_v44 = vmax.f32 %v812_v40, 0.0  ;;  %v797_v46 = vmul.f32 %v1661_v62, %v777_v56  ;;  %v652_v5 = vadd.f32 %v651_v31, %v588_v42  ;;  %v654_v50 = vpop.f32.mrf.mxu1 }
 0x16f   : > { %v844_v45 = vpack.c.bf16 %v828_v44, %v828_v44  ;;  %v817_v47 = vadd.f32 %v1666_v23, %v797_v46  ;;  %v773_v48 = vadd.f32 %v746_v34, %v652_v5 }
 0x171   : > { %861 = vst.msk [vmem:[%s1675_s30 + $0x20] sm:$0xf] %vm852_vm12, %v844_v45  ;;  %v833_v37 = vmax.f32 %v817_v47, 0.0  ;;  %v793_v39 = vmul.f32 %v1661_v62, %v773_v48 }
 0x172   : > { %v759_v51 = vpop.f32.mrf.mxu3  ;;  %v749_v57 = vpop.f32.mrf.mxu2 }
 0x173   : > { %v849_v53 = vpack.c.bf16 %v833_v37, %v833_v37  ;;  %v813_v55 = vadd.f32 %v1666_v23, %v793_v39  ;;  %v778_v61 = vadd.f32 %v759_v51, %v665_v43 }
 0x174   : > { %v591_v58 = vpop.f32.mrf.mxu0 }
 0x175   : > { %866 = vst.msk [vmem:[%s1675_s30 + $0x34] sm:$0xf] %vm852_vm12, %v849_v53  ;;  %v829_v3 = vmax.f32 %v813_v55, 0.0  ;;  %v798_v17 = vmul.f32 %v1661_v62, %v778_v61  ;;  %v655_v49 = vadd.f32 %v654_v50, %v591_v58  ;;  %v656_v1 = vpop.f32.mrf.mxu1 }
 0x177   : > { %v845_v52 = vpack.c.bf16 %v829_v3, %v829_v3  ;;  %v818_v59 = vadd.f32 %v1666_v23, %v798_v17  ;;  %v774_v15 = vadd.f32 %v749_v57, %v655_v49 }
 0x179   : > { %862 = vst.msk [vmem:[%s1675_s30 + $0x24] sm:$0xf] %vm852_vm12, %v845_v52  ;;  %v834_v11 = vmax.f32 %v818_v59, 0.0  ;;  %v794_v14 = vmul.f32 %v1661_v62, %v774_v15 }
 0x17a   : > { %v761_v4 = vpop.f32.mrf.mxu3  ;;  %v751_v7 = vpop.f32.mrf.mxu2 }
 0x17b   : > { %v850_v60 = vpack.c.bf16 %v834_v11, %v834_v11  ;;  %v814_v10 = vadd.f32 %v1666_v23, %v794_v14  ;;  %v779_v63 = vadd.f32 %v761_v4, %v667_v0 }
 0x17c   : > { %v593_v19 = vpop.f32.mrf.mxu0 }
 0x17d   : > { %867 = vst.msk [vmem:[%s1675_s30 + $0x38] sm:$0xf] %vm852_vm12, %v850_v60  ;;  %v830_v24 = vmax.f32 %v814_v10, 0.0  ;;  %v799_v9 = vmul.f32 %v1661_v62, %v779_v63  ;;  %v657_v6 = vadd.f32 %v656_v1, %v593_v19 }
 0x17f   : > { %v846_v8 = vpack.c.bf16 %v830_v24, %v830_v24  ;;  %v819_v12 = vadd.f32 %v1666_v23, %v799_v9  ;;  %v775_v13 = vadd.f32 %v751_v7, %v657_v6 }
 0x181   : > { %863 = vst.msk [vmem:[%s1675_s30 + $0x28] sm:$0xf] %vm852_vm12, %v846_v8  ;;  %v835_v28 = vmax.f32 %v819_v12, 0.0  ;;  %v795_v16 = vmul.f32 %v1661_v62, %v775_v13 }
 0x183   : > { %v851_v2 = vpack.c.bf16 %v835_v28, %v835_v28  ;;  %v815_v21 = vadd.f32 %v1666_v23, %v795_v16 }
 0x185   : > { %868 = vst.msk [vmem:[%s1675_s30 + $0x3c] sm:$0xf] %vm852_vm12, %v851_v2  ;;  %v831_v32 = vmax.f32 %v815_v21, 0.0 }
 0x187   : > { %v847_v18 = vpack.c.bf16 %v831_v32, %v831_v32 }
 0x189   : > { %864 = vst.msk [vmem:[%s1675_s30 + $0x2c] sm:$0xf] %vm852_vm12, %v847_v18 }
 0x18a   : > { %1194 = shalt.err (!%p1191_p11)
}
 0x18b   : > { %s1265_s24 = smov 64   ;;  %s1266_s30 = smov 4  }
 0x18c   : > { %1090 = dma.vmem_to_hbm [thread:$0]  (%p1343_p3), %s886_s11, 1024, %s888_s12, %s870_s13, %s1265_s24, %s1265_s24, %s1266_s30  }
 0x18d PF: > { %p1096_p12 = scmp.ge.s32.totalorder %s1261_s22, 2  ;;  %s902_s19 = sand.u32 1, %s1233_s15  }
 0x18e   : > { %s903_s9 = scalar_lea.sflag [#allocation3], %s902_s19 }
 0x18f   : > { %p1093_p13 = pnand %p1096_p12, %p1352_p8 }
 0x191   : > { %p1094_p0 = pneg %p1093_p13 }
 0x193   : > { %1228 = dma.done.wait (%p1094_p0), %s903_s9, 1024  }
 0x194   : > { %1230 = vsyncadd (%p1094_p0), %s903_s9, 4294966272  ;;  %s17_s22 = sadd.s32 1, %s1261_s22   ;;  %s1804_s15 = smov %s1237_s16 }
 0x195   : > { %p14_p1 = scmp.ge.s32.totalorder %s17_s22, 6   ;;  %s1805_s16 = smov %s1241_s17 }
 0x196   : > { %s1806_s17 = smov %s1361_s7  ;;  %s1807_s18 = smov %s1253_s20 }
 0x197   : > { %s1808_s19 = smov %s1257_s21  ;;  %s1809_s20 = smov %s1812_s25 }
 0x198   : > { %s1810_s21 = smov %s1816_s26  ;;  %16 = sbr.rel (!%p14_p1) target bundleno = 5 (0x5), region = 76 }
 0x19d   :  { %909 = vsyncpa [#allocation3], 1 }
 0x19e   :  { %911 = vsyncpa [#allocation3 + $0x1], 1 }

</bundles_post_ra>
